<compile_context>
chip_gen: v5e
topology: v5e:2x2
jax: 0.10.0
libtpu: 0.0.40
codegen_flags: <defaults>
</compile_context>

<pallas_src>
import functools

import numpy as np
import jax
import jax.numpy as jnp
from jax import lax
from jax.experimental import pallas as pl
from jax.experimental.pallas import tpu as pltpu

INV_SQRT_2PI = float(1.0 / np.sqrt(2.0 * 3.1415926))
EPS = 1e-32

# TODO(synk): the model sampling loop (model.get_sampling_output), tqdm progress and the
# pickle dump of (sids, atoms, tags, poses) have no Pallas equivalent; sampled poses are
# taken as kernel inputs.


def _flow_ode_kl_kernel(x_ref, p_ref, m_ref, inv_ref, out_ref, *, S, P):
    """One chunk of `bt` systems, fully vectorized over the chunk (no per-system loop).

    x_ref   : VMEM f32 [bt, S, K]   sampled poses (raw, unmasked)
    p_ref   : VMEM f32 [bt, P, K]   reference poses (raw, unmasked)
    m_ref   : VMEM f32 [bt, 1, K]   {0,1} atom mask expanded over xyz
    inv_ref : VMEM f32 [bt, 1, 1]   1 / (num_moveable * kde_temperature)
    out_ref : VMEM f32 [1, 8, 128]  this chunk's partial kl_div sum (lane-dense broadcast)
    """
    m = m_ref[...]
    # Fused [S+P, K] coordinate matrix per system; mask in-kernel (no wrapper round trip).
    y = jnp.concatenate([x_ref[...] * m, p_ref[...] * m], axis=1)        # [bt, S+P, K]
    # Center per system: pairwise distances are translation invariant; keeps the Gram
    # identity well conditioned for large absolute coordinates (masked coords stay 0).
    y = y - jnp.mean(y, axis=1, keepdims=True)

    # Single fused (self + cross) Gram per chunk; true-f32 MXU precision.
    g = jnp.einsum("bik,bjk->bij", y, y,
                   preferred_element_type=jnp.float32,
                   precision=lax.Precision.HIGHEST)                       # [bt, S+P, S+P]

    # Row/column squared norms straight from the Gram diagonal (no transpose needed).
    eye = (lax.broadcasted_iota(jnp.int32, (1, S + P, S + P), 1)
           == lax.broadcasted_iota(jnp.int32, (1, S + P, S + P), 2)).astype(jnp.float32)
    gd = g * eye
    nrm_row = jnp.sum(gd, axis=2, keepdims=True)                          # [bt, S+P, 1]
    nrm_col = jnp.sum(gd, axis=1, keepdims=True)                          # [bt, 1, S+P]

    # Squared masked distances (no sqrt: it cancels against the later square).
    d2 = jnp.maximum(nrm_row[:, :S, :] + nrm_col - 2.0 * g[:, :S, :], 0.0)  # [bt, S, S+P]

    # KDE probs; the 1/sqrt(2pi) and /temp constants cancel in the normalization.
    ap = jnp.exp(-d2 * inv_ref[...])                                      # [bt, S, S+P]
    col = lax.broadcasted_iota(jnp.int32, (1, 1, S + P), 2)
    is_self = (col < S).astype(jnp.float32)
    sp = jnp.sum(ap * is_self, axis=-1, keepdims=True) / float(S)         # [bt, S, 1]
    rp = jnp.sum(ap * (1.0 - is_self), axis=-1, keepdims=True) / float(P)
    sp = sp / (jnp.sum(sp, axis=1, keepdims=True) + EPS)
    rp = rp / (jnp.sum(rp, axis=1, keepdims=True) + EPS)

    # KL(self || ref) per system; guard 0 * log(0) -> 0.
    term = jnp.where(sp > 0.0, sp * jnp.log(sp / (rp + EPS)), 0.0)
    kl = (jnp.sum(term, axis=1, keepdims=True)
          / (jnp.sum(sp, axis=1, keepdims=True) + EPS))                   # [bt, 1, 1]

    # Lane-dense full-tile store of this chunk's partial sum.
    out_ref[...] = jnp.broadcast_to(jnp.sum(kl, axis=0), out_ref.shape)


def _choose_bt(B, requested):
    """Systems per grid step: as large as requested (amortize ~0.35us/step, fill DMA),
    but keep >= 2 chunks so a v7x megacore can split the parallel axis, and prefer a
    divisor of B so the wrapper never materializes padded copies of the pose arrays."""
    bt = max(1, min(int(requested), int(B)))
    if B >= 2:
        bt = min(bt, max(1, B // 2))
    if B % bt == 0:
        return bt
    best = max(d for d in range(1, bt + 1) if B % d == 0)
    return best if 2 * best >= bt else bt   # fall back to padding only if divisor costs >2x steps


def flow_ode_kl(all_outputs, all_poses, atoms, num_moveable, kde_temperature=0.1,
                systems_per_step=16):
    """JAX wrapper reproducing FlowODE.forward()'s KL-divergence computation.

    all_outputs  : [B, S, N, 3] sampled poses (S = n_kde_samples)
    all_poses    : [B, P, N, 3] reference poses
    atoms        : [B, N]       atom ids (0 == padding)
    num_moveable : [B]          number of moveable atoms per system
    returns      : scalar kl_div_sum
    """
    B, S, N, _ = all_outputs.shape
    P = all_poses.shape[1]
    K = N * 3

    # Free reshapes only (trailing-dim merges); no mask-multiply / K-pad round trip here.
    x = all_outputs.reshape(B, S, K).astype(jnp.float32)
    p = all_poses.reshape(B, P, K).astype(jnp.float32)
    mask = jnp.repeat((atoms != 0).astype(jnp.float32)[:, :, None], 3,
                      axis=-1).reshape(B, 1, K)
    inv = (1.0 / (num_moveable.astype(jnp.float32)
                  * float(kde_temperature))).reshape(B, 1, 1)

    bt = _choose_bt(B, systems_per_step)

    # Generation-aware VMEM budget (v7x: 64 MiB physical; v5e/v6e: 128 MiB).
    try:
        vmem_cap = int(pltpu.get_tpu_info().vmem_capacity_bytes)
    except Exception:
        vmem_cap = 64 << 20
    usable = vmem_cap - (8 << 20)

    def need_bytes(bt_):
        kp = -(-K // 128) * 128
        rows = (-(-S // 8) * 8) + (-(-P // 8) * 8) + 8 + 8        # x + p + mask + inv tiles
        spp = -(-(S + P) // 8) * 8
        block = 4 * bt_ * rows * kp                               # one input block (per buffer)
        interm = 4 * bt_ * (2 * spp * kp + 8 * spp * 128)         # Y (masked+centered), G/d2/ap/...
        return 2 * block + interm + 2 * (8 * 128 * 4) + (1 << 20)

    while bt > 1 and need_bytes(bt) > usable:
        bt = max(1, bt // 2)
    vmem_limit = int(min(max(need_bytes(bt), 32 << 20), usable))

    n_chunks = -(-B // bt)
    Bp = n_chunks * bt
    if Bp > B:  # only materializes copies when bt does not divide B
        pad = Bp - B
        x = jnp.pad(x, ((0, pad), (0, 0), (0, 0)))
        p = jnp.pad(p, ((0, pad), (0, 0), (0, 0)))
        mask = jnp.pad(mask, ((0, pad), (0, 0), (0, 0)))
        inv = jnp.pad(inv, ((0, pad), (0, 0), (0, 0)), constant_values=1.0)

    out = pl.pallas_call(
        functools.partial(_flow_ode_kl_kernel, S=S, P=P),
        out_shape=jax.ShapeDtypeStruct((n_chunks, 8, 128), jnp.float32),
        grid_spec=pltpu.PrefetchScalarGridSpec(
            num_scalar_prefetch=0,
            grid=(n_chunks,),
            in_specs=[
                pl.BlockSpec((bt, S, K), lambda c: (c, 0, 0)),
                pl.BlockSpec((bt, P, K), lambda c: (c, 0, 0)),
                pl.BlockSpec((bt, 1, K), lambda c: (c, 0, 0)),
                pl.BlockSpec((bt, 1, 1), lambda c: (c, 0, 0)),
            ],
            out_specs=pl.BlockSpec((1, 8, 128), lambda c: (c, 0, 0)),
        ),
        compiler_params=pltpu.CompilerParams(
            dimension_semantics=("parallel",),
            vmem_limit_bytes=vmem_limit,
        ),
    )(x, p, mask, inv)
    return jnp.sum(out[:, 0, 0])


def _reference_kl(all_outputs, all_poses, atoms, num_moveable, temp):
    """Pure-JAX transcription of the PyTorch code (for verification)."""
    mask = (atoms != 0)[:, None, None, :].astype(jnp.float32)                  # [B,1,1,N]
    nm = num_moveable[:, None, None].astype(jnp.float32)                       # [B,1,1]
    d_self = jnp.sum((all_outputs[:, None] - all_outputs[:, :, None]) ** 2, axis=-1)
    rmsds = jnp.sqrt(jnp.sum(d_self * mask, axis=-1) / nm)                     # [B,S,S]
    d_ref = jnp.sum((all_outputs[:, :, None] - all_poses[:, None]) ** 2, axis=-1)
    rmsds_ref = jnp.sqrt(jnp.sum(d_ref * mask, axis=-1) / nm)                  # [B,S,P]

    def probs_fn(r):
        ap = INV_SQRT_2PI * jnp.exp(-(r ** 2) / temp)
        pr = jnp.mean(ap, axis=-1) / temp
        return pr / (jnp.sum(pr, axis=-1, keepdims=True) + EPS)

    sp = probs_fn(rmsds)
    rp = probs_fn(rmsds_ref)
    kl = jnp.sum(sp * jnp.log(sp / (rp + EPS)), axis=1) / (jnp.sum(sp, axis=1) + EPS)
    return jnp.sum(kl)


if __name__ == "__main__":
    # Small deterministic problem: B=2 systems, S=8 KDE samples, P=8 reference
    # poses, N=16 atoms, 3D coordinates.
    B, S, P, N = 2, 8, 8, 16
    TEMP = 0.1

    key = jax.random.PRNGKey(0)
    k1, k2, k3 = jax.random.split(key, 3)
    all_outputs = 0.2 * jax.random.normal(k1, (B, S, N, 3), dtype=jnp.float32)
    all_poses = 0.2 * jax.random.normal(k2, (B, P, N, 3), dtype=jnp.float32)
    atoms = jax.random.randint(k3, (B, N), 0, 5)           # 0 == padding atom
    num_moveable = jnp.array([10, 12], dtype=jnp.int32)

    kl_sum = jax.block_until_ready(
        flow_ode_kl(all_outputs, all_poses, atoms, num_moveable, TEMP))
    ref = jax.block_until_ready(
        _reference_kl(all_outputs, all_poses, atoms, num_moveable, TEMP))
    assert jnp.isfinite(kl_sum), "kernel produced non-finite result"
    assert jnp.allclose(kl_sum, ref, rtol=1e-3, atol=1e-5), (kl_sum, ref)

    # Shifted coordinates (realistic absolute magnitudes) exercise the in-kernel
    # centering + HIGHEST-precision Gram numerics.
    kl_sum_s = jax.block_until_ready(
        flow_ode_kl(all_outputs + 30.0, all_poses + 30.0, atoms, num_moveable, TEMP))
    ref_s = jax.block_until_ready(
        _reference_kl(all_outputs + 30.0, all_poses + 30.0, atoms, num_moveable, TEMP))
    assert jnp.isfinite(kl_sum_s), "kernel produced non-finite result (shifted)"
    assert jnp.allclose(kl_sum_s, ref_s, rtol=1e-3, atol=1e-4), (kl_sum_s, ref_s)

    print("KERNEL_OK")
</pallas_src>

<mosaic_0001>
module attributes {stable_mosaic.version = 11 : i64} {
  func.func @_flow_ode_kl_kernel(%arg0: i32, %arg1: memref<1x8x48xf32, #tpu.memory_space<vmem>>, %arg2: memref<1x8x48xf32, #tpu.memory_space<vmem>>, %arg3: memref<1x1x48xf32, #tpu.memory_space<vmem>>, %arg4: memref<1x1x1xf32, #tpu.memory_space<vmem>>, %arg5: memref<1x8x128xf32, #tpu.memory_space<vmem>>) attributes {dimension_semantics = [#tpu.dimension_semantics<parallel>], iteration_bounds = array<i64: 2>, scalar_prefetch = 0 : i64, scratch_operands = 0 : i64, tpu.core_type = #tpu.core_type<tc>, window_params = [{transform_indices = @transform_0, window_bounds = array<i64: 1, 8, 48>}, {transform_indices = @transform_1, window_bounds = array<i64: 1, 8, 48>}, {transform_indices = @transform_2, window_bounds = array<i64: 1, 1, 48>}, {transform_indices = @transform_3, window_bounds = array<i64: 1, 1, 1>}, {transform_indices = @transform_4, window_bounds = array<i64: 1, 8, 128>}]} {
    %c0 = arith.constant 0 : index
    %c0_0 = arith.constant 0 : index
    %c0_1 = arith.constant 0 : index
    %0 = vector.load %arg3[%c0, %c0_0, %c0_1] : memref<1x1x48xf32, #tpu.memory_space<vmem>>, vector<1x1x48xf32>
    %c0_2 = arith.constant 0 : index
    %c0_3 = arith.constant 0 : index
    %c0_4 = arith.constant 0 : index
    %1 = vector.load %arg1[%c0_2, %c0_3, %c0_4] : memref<1x8x48xf32, #tpu.memory_space<vmem>>, vector<1x8x48xf32>
    %2 = vector.broadcast %0 : vector<1x1x48xf32> to vector<1x8x48xf32>
    %3 = arith.mulf %1, %2 : vector<1x8x48xf32>
    %c0_5 = arith.constant 0 : index
    %c0_6 = arith.constant 0 : index
    %c0_7 = arith.constant 0 : index
    %4 = vector.load %arg2[%c0_5, %c0_6, %c0_7] : memref<1x8x48xf32, #tpu.memory_space<vmem>>, vector<1x8x48xf32>
    %5 = vector.broadcast %0 : vector<1x1x48xf32> to vector<1x8x48xf32>
    %6 = arith.mulf %4, %5 : vector<1x8x48xf32>
    %7 = tpu.concatenate %3, %6 in 1 : vector<1x8x48xf32>, vector<1x8x48xf32> -> vector<1x16x48xf32>
    %cst = arith.constant dense<0.000000e+00> : vector<1x48xf32>
    %8 = vector.multi_reduction <add>, %7, %cst [1] : vector<1x16x48xf32> to vector<1x48xf32>
    %9 = vector.shape_cast %8 : vector<1x48xf32> to vector<1x1x48xf32>
    %cst_8 = arith.constant 1.600000e+01 : f32
    %10 = vector.broadcast %cst_8 : f32 to vector<1x1x48xf32>
    %11 = arith.divf %9, %10 : vector<1x1x48xf32>
    %12 = vector.broadcast %11 : vector<1x1x48xf32> to vector<1x16x48xf32>
    %13 = arith.subf %7, %12 : vector<1x16x48xf32>
    "tpu.trace_start"() <{level = 10 : i32, message = "bik,bjk->bij"}> : () -> ()
    %cst_9 = arith.constant dense<0.000000e+00> : vector<1x16x16xf32>
    %14 = tpu.matmul %13, %13, %cst_9 {dimension_numbers = #tpu.dot_dimension_numbers<[2], [2], [1], [1], [0, 0, 0, 1, 1, 1], [0], [0]>, precision = #tpu.contract_precision<fp32>} : vector<1x16x48xf32>, vector<1x16x48xf32>, vector<1x16x16xf32> -> vector<1x16x16xf32>
    "tpu.trace_stop"() : () -> ()
    %15 = tpu.iota {dimensions = array<i32: 1>} : vector<1x16x16xi32>
    %16 = tpu.iota {dimensions = array<i32: 2>} : vector<1x16x16xi32>
    %17 = arith.cmpi eq, %15, %16 : vector<1x16x16xi32>
    %18 = arith.extui %17 : vector<1x16x16xi1> to vector<1x16x16xi32>
    %19 = arith.sitofp %18 : vector<1x16x16xi32> to vector<1x16x16xf32>
    %20 = arith.mulf %14, %19 : vector<1x16x16xf32>
    %cst_10 = arith.constant dense<0.000000e+00> : vector<1x16xf32>
    %21 = vector.multi_reduction <add>, %20, %cst_10 [2] : vector<1x16x16xf32> to vector<1x16xf32>
    %22 = vector.shape_cast %21 : vector<1x16xf32> to vector<1x16x1xf32>
    %cst_11 = arith.constant dense<0.000000e+00> : vector<1x16xf32>
    %23 = vector.multi_reduction <add>, %20, %cst_11 [1] : vector<1x16x16xf32> to vector<1x16xf32>
    %24 = vector.shape_cast %23 : vector<1x16xf32> to vector<1x1x16xf32>
    %25 = vector.extract_strided_slice %22 {offsets = [0, 0, 0], sizes = [1, 8, 1], strides = [1, 1, 1]} : vector<1x16x1xf32> to vector<1x8x1xf32>
    %26 = vector.broadcast %25 : vector<1x8x1xf32> to vector<1x8x16xf32>
    %27 = vector.broadcast %24 : vector<1x1x16xf32> to vector<1x8x16xf32>
    %28 = arith.addf %26, %27 : vector<1x8x16xf32>
    %29 = vector.extract_strided_slice %14 {offsets = [0, 0, 0], sizes = [1, 8, 16], strides = [1, 1, 1]} : vector<1x16x16xf32> to vector<1x8x16xf32>
    %cst_12 = arith.constant 2.000000e+00 : f32
    %30 = vector.broadcast %cst_12 : f32 to vector<1x8x16xf32>
    %31 = arith.mulf %30, %29 : vector<1x8x16xf32>
    %32 = arith.subf %28, %31 : vector<1x8x16xf32>
    %cst_13 = arith.constant 0.000000e+00 : f32
    %33 = vector.broadcast %cst_13 : f32 to vector<1x8x16xf32>
    %34 = arith.maximumf %32, %33 : vector<1x8x16xf32>
    %cst_14 = arith.constant 0.000000e+00 : f32
    %35 = vector.broadcast %cst_14 : f32 to vector<1x8x16xf32>
    %36 = arith.subf %35, %34 : vector<1x8x16xf32>
    %c0_15 = arith.constant 0 : index
    %c0_16 = arith.constant 0 : index
    %c0_17 = arith.constant 0 : index
    %37 = vector.load %arg4[%c0_15, %c0_16, %c0_17] : memref<1x1x1xf32, #tpu.memory_space<vmem>>, vector<1x1x1xf32>
    %38 = vector.broadcast %37 : vector<1x1x1xf32> to vector<1x8x16xf32>
    %39 = arith.mulf %36, %38 : vector<1x8x16xf32>
    %40 = math.exp %39 : vector<1x8x16xf32>
    %41 = tpu.iota {dimensions = array<i32: 2>} : vector<1x1x16xi32>
    %c8_i32 = arith.constant 8 : i32
    %42 = vector.broadcast %c8_i32 : i32 to vector<1x1x16xi32>
    %43 = arith.cmpi slt, %41, %42 : vector<1x1x16xi32>
    %44 = arith.extui %43 : vector<1x1x16xi1> to vector<1x1x16xi32>
    %45 = arith.sitofp %44 : vector<1x1x16xi32> to vector<1x1x16xf32>
    %46 = vector.broadcast %45 : vector<1x1x16xf32> to vector<1x8x16xf32>
    %47 = arith.mulf %40, %46 : vector<1x8x16xf32>
    %cst_18 = arith.constant dense<0.000000e+00> : vector<1x8xf32>
    %48 = vector.multi_reduction <add>, %47, %cst_18 [2] : vector<1x8x16xf32> to vector<1x8xf32>
    %49 = vector.shape_cast %48 : vector<1x8xf32> to vector<1x8x1xf32>
    %cst_19 = arith.constant 8.000000e+00 : f32
    %50 = vector.broadcast %cst_19 : f32 to vector<1x8x1xf32>
    %51 = arith.divf %49, %50 : vector<1x8x1xf32>
    %cst_20 = arith.constant 1.000000e+00 : f32
    %52 = vector.broadcast %cst_20 : f32 to vector<1x1x16xf32>
    %53 = arith.subf %52, %45 : vector<1x1x16xf32>
    %54 = vector.broadcast %53 : vector<1x1x16xf32> to vector<1x8x16xf32>
    %55 = arith.mulf %40, %54 : vector<1x8x16xf32>
    %cst_21 = arith.constant dense<0.000000e+00> : vector<1x8xf32>
    %56 = vector.multi_reduction <add>, %55, %cst_21 [2] : vector<1x8x16xf32> to vector<1x8xf32>
    %57 = vector.shape_cast %56 : vector<1x8xf32> to vector<1x8x1xf32>
    %cst_22 = arith.constant 8.000000e+00 : f32
    %58 = vector.broadcast %cst_22 : f32 to vector<1x8x1xf32>
    %59 = arith.divf %57, %58 : vector<1x8x1xf32>
    %cst_23 = arith.constant dense<0.000000e+00> : vector<1x1xf32>
    %60 = vector.multi_reduction <add>, %51, %cst_23 [1] : vector<1x8x1xf32> to vector<1x1xf32>
    %61 = vector.shape_cast %60 : vector<1x1xf32> to vector<1x1x1xf32>
    %cst_24 = arith.constant 1.000000e-32 : f32
    %62 = vector.broadcast %cst_24 : f32 to vector<1x1x1xf32>
    %63 = arith.addf %61, %62 : vector<1x1x1xf32>
    %64 = vector.broadcast %63 : vector<1x1x1xf32> to vector<1x8x1xf32>
    %65 = arith.divf %51, %64 : vector<1x8x1xf32>
    %cst_25 = arith.constant dense<0.000000e+00> : vector<1x1xf32>
    %66 = vector.multi_reduction <add>, %59, %cst_25 [1] : vector<1x8x1xf32> to vector<1x1xf32>
    %67 = vector.shape_cast %66 : vector<1x1xf32> to vector<1x1x1xf32>
    %cst_26 = arith.constant 1.000000e-32 : f32
    %68 = vector.broadcast %cst_26 : f32 to vector<1x1x1xf32>
    %69 = arith.addf %67, %68 : vector<1x1x1xf32>
    %70 = vector.broadcast %69 : vector<1x1x1xf32> to vector<1x8x1xf32>
    %71 = arith.divf %59, %70 : vector<1x8x1xf32>
    %cst_27 = arith.constant 0.000000e+00 : f32
    %72 = vector.broadcast %cst_27 : f32 to vector<1x8x1xf32>
    %73 = arith.cmpf ogt, %65, %72 : vector<1x8x1xf32>
    %cst_28 = arith.constant 1.000000e-32 : f32
    %74 = vector.broadcast %cst_28 : f32 to vector<1x8x1xf32>
    %75 = arith.addf %71, %74 : vector<1x8x1xf32>
    %76 = arith.divf %65, %75 : vector<1x8x1xf32>
    %77 = math.log %76 : vector<1x8x1xf32>
    %78 = arith.mulf %65, %77 : vector<1x8x1xf32>
    %cst_29 = arith.constant 0.000000e+00 : f32
    %79 = vector.broadcast %cst_29 : f32 to vector<1x8x1xf32>
    %80 = arith.select %73, %78, %79 : vector<1x8x1xi1>, vector<1x8x1xf32>
    %cst_30 = arith.constant dense<0.000000e+00> : vector<1x1xf32>
    %81 = vector.multi_reduction <add>, %80, %cst_30 [1] : vector<1x8x1xf32> to vector<1x1xf32>
    %82 = vector.shape_cast %81 : vector<1x1xf32> to vector<1x1x1xf32>
    %cst_31 = arith.constant dense<0.000000e+00> : vector<1x1xf32>
    %83 = vector.multi_reduction <add>, %65, %cst_31 [1] : vector<1x8x1xf32> to vector<1x1xf32>
    %84 = vector.shape_cast %83 : vector<1x1xf32> to vector<1x1x1xf32>
    %cst_32 = arith.constant 1.000000e-32 : f32
    %85 = vector.broadcast %cst_32 : f32 to vector<1x1x1xf32>
    %86 = arith.addf %84, %85 : vector<1x1x1xf32>
    %87 = arith.divf %82, %86 : vector<1x1x1xf32>
    %cst_33 = arith.constant dense<0.000000e+00> : vector<1x1xf32>
    %88 = vector.multi_reduction <add>, %87, %cst_33 [0] : vector<1x1x1xf32> to vector<1x1xf32>
    %89 = vector.shape_cast %88 : vector<1x1xf32> to vector<1x1x1xf32>
    %90 = vector.broadcast %89 : vector<1x1x1xf32> to vector<1x8x128xf32>
    %c0_34 = arith.constant 0 : index
    %c0_35 = arith.constant 0 : index
    %c0_36 = arith.constant 0 : index
    %91 = vector.load %arg5[%c0_34, %c0_35, %c0_36] : memref<1x8x128xf32, #tpu.memory_space<vmem>>, vector<1x8x128xf32>
    tpu.vector_store %arg5[%c0_34, %c0_35, %c0_36], %90 {strides = array<i32>} : memref<1x8x128xf32, #tpu.memory_space<vmem>>, vector<1x8x128xf32>,
    return
  }
  func.func @transform_0(%arg0: i32) -> (i32, i32, i32) {
    %c0_i32 = arith.constant 0 : i32
    %c0_i32_0 = arith.constant 0 : i32
    %c0_i32_1 = arith.constant 0 : i32
    return %arg0, %c0_i32, %c0_i32_0 : i32, i32, i32
  }
  func.func @transform_1(%arg0: i32) -> (i32, i32, i32) {
    %c0_i32 = arith.constant 0 : i32
    %c0_i32_0 = arith.constant 0 : i32
    %c0_i32_1 = arith.constant 0 : i32
    return %arg0, %c0_i32, %c0_i32_0 : i32, i32, i32
  }
  func.func @transform_2(%arg0: i32) -> (i32, i32, i32) {
    %c0_i32 = arith.constant 0 : i32
    %c0_i32_0 = arith.constant 0 : i32
    %c0_i32_1 = arith.constant 0 : i32
    return %arg0, %c0_i32, %c0_i32_0 : i32, i32, i32
  }
  func.func @transform_3(%arg0: i32) -> (i32, i32, i32) {
    %c0_i32 = arith.constant 0 : i32
    %c0_i32_0 = arith.constant 0 : i32
    %c0_i32_1 = arith.constant 0 : i32
    return %arg0, %c0_i32, %c0_i32_0 : i32, i32, i32
  }
  func.func @transform_4(%arg0: i32) -> (i32, i32, i32) {
    %c0_i32 = arith.constant 0 : i32
    %c0_i32_0 = arith.constant 0 : i32
    %c0_i32_1 = arith.constant 0 : i32
    return %arg0, %c0_i32, %c0_i32_0 : i32, i32, i32
  }
}

</mosaic_0001>

<bundles_post_ra>
// kernel: tpu_custom_call.1
= control target key start
LH: loop header
LB: loop body
LE: loop exit
PB: predicated region body
PF: predicated region fallthrough
CT: control target
= control target key end

     0   :  { %s1236_s0 = inlined_call_operand.hbm [shape: f32[2,8,48], index: 0, kind: input, shape index: {}]   ;;  %s1237_s1 = inlined_call_operand.hbm [shape: f32[2,8,48], index: 1, kind: input, shape index: {}]   ;;  %s1238_s2 = inlined_call_operand.vmem [shape: f32[2,1,48], index: 2, kind: input, shape index: {}]   ;;  %s1239_s3 = inlined_call_operand.vmem [shape: f32[2,1,1], index: 3, kind: input, shape index: {}]   ;;  %s1240_s4 = inlined_call_operand.hbm [shape: f32[2,8,128], index: 4, kind: output, shape index: {}]  }
   0x1   :  { %1241 = sst [smem:[#allocation11_spill]] %s1236_s0 }
   0x2   :  { %9 = vsyncpa [#allocation3], 0 }
   0x3   :  { %11 = vsyncpa [#allocation3 + $0x1], 0 }
   0x4   :  { %12 = vsyncpa [#allocation6], 0 }
   0x5   :  { %14 = vsyncpa [#allocation6 + $0x1], 0 }
   0x6   :  { %15 = vsyncpa [#allocation4], 0 }
   0x7   :  { %17 = vsyncpa [#allocation4 + $0x1], 0  ;;  %s1046_s15 = smov 0   ;;  %s1048_s16 = smov 0  }
   0x8   :  { %s1050_s17 = smov 0   ;;  %s1052_s18 = smov 0  }
   0x9 LB: > { %s1067_s19 = sadd.s32 4294967295, %s1015_s18   ;;  %s789_s20 = sadd.s32 4294967294, %s1015_s18   ;;  %s1015_s18 = sphi %s1052_s18, %s1253_s18   ;;  %s1011_s17 = sphi %s1050_s17, %s1252_s17   ;;  %s1007_s16 = sphi %s1048_s16, %s1251_s16   ;;  %s1003_s15 = sphi %s1046_s15, %s1250_s15  }
   0xa   : > { %s1071_s21 = sadd.s32 1, %s1015_s18   ;;  %s30_s22 = sadd.s32 1, %s1011_s17 }
   0xb   : > { %s27_s23 = ssub.s32 %s1015_s18, %s1071_s21  ;;  %p37_p0 = scmp.ne.s32.totalorder %s1011_s17, %s1007_s16 }
   0xc   : > { %p28_p1 = scmp.eq.s32.totalorder %s27_s23, 0  ;;  %p38_p2 = scmp.eq.s32.totalorder %s1015_s18, 0 }
   0xd   : > { %p43_p3 = scmp.ne.s32.totalorder %s1007_s16, %s1003_s15  ;;  %p44_p4 = scmp.eq.s32.totalorder %s1067_s19, 0 }
   0xe   : > { %s1083_s24 = scalar_select %p28_p1, %s1011_s17, %s30_s22  }
   0xf   : > { %p1085_p5 = por %p38_p2, %p37_p0  ;;  %p1089_p6 = por %p44_p4, %p43_p3 }
  0x10   : > { %p145_p7 = scmp.eq.s32.totalorder %s1067_s19, 1  ;;  %p151_p8 = scmp.eq.s32.totalorder %s789_s20, 1 }
  0x11   : > { %p828_p10 = scmp.lt.s32.totalorder %s1015_s18, 2  ;;  %s1105_s29 = sand.u32 1, %s1011_s17  }
  0x12   : > { %p1096_p11 = por %p145_p7, %p37_p0  ;;  %p1100_p12 = por %p151_p8, %p43_p3 }
  0x13   : > { %s793_s30 = sshll.u32 %s1015_s18, 3  ;;  %s792_s5 = sshll.u32 %s1105_s29, 3 }
  0x14   : > { %s1246_s0 = sld [smem:[#allocation11_spill]]  ;;  %s175_s10 = scalar_lea.vmem [#allocation2], %s792_s5 }
  0x15   : > { %s183_s11 = sshll.u32 %s175_s10, 4  ;;  %p1114_p13 = pnand %p828_p10, %p1085_p5  ;;  %s184_s11 = int_to_ptr.vmem [resolvable:$true] %s183_s11 }
  0x16   : > { %p796_p0 = scmp.ge.s32.totalorder %s1015_s18, 1  ;;  %p219_p1 = scmp.lt.s32.totalorder %s1015_s18, 3 }
  0x17   : > { %s172_s13 = scalar_lea.sflag [#allocation3], %s1105_s29  ;;  %p889_p3 = pneg %p1114_p13 }
  0x1a   : > { %s179_s8 = scalar_lea.hbm %s1246_s0, %s793_s30  ;;  %s892_s25 = scalar_lea.hbm %s1246_s0, 16 }
  0x1b   : > { %s181_s9 = sshll.u32 %s179_s8, 4  ;;  %s182_s9 = int_to_ptr.hbm [resolvable:$true] %s181_s9 }
  0x1c   : > { %s885_s14 = sshra.s32 %s182_s9, 4  ;;  %s886_s14 = int_to_ptr.hbm [resolvable:$true] %s885_s14 }
  0x1d   : > { %s887_s20 = scalar_lea.hbm %s886_s14, 8  ;;  %p893_p5 = scmp.lt.s32.totalorder %s886_s14, %s1246_s0 }
  0x1e   : > { %p888_p2 = scmp.ne.s32.totalorder %s886_s14, %s887_s20  ;;  %p894_p8 = scmp.lt.s32.totalorder %s892_s25, %s887_s20 }
  0x20   : > { %p890_p4 = pnand %p889_p3, %p888_p2  ;;  %p895_p10 = por %p894_p8, %p893_p5 }
  0x22   : > { %p891_p7 = pneg %p890_p4 }
  0x24   : > { %p896_p9 = pnand %p895_p10, %p891_p7 }
  0x26   : > { %899 = shalt.err (!%p896_p9)
}
  0x27   : > { %820 = dma.hbm_to_vmem [thread:$0]  (!%p1114_p13), %s182_s9, 128, %s184_s11, %s172_s13  }
  0x28   : > { %p1138_p2 = pnand %p796_p0, %p219_p1  ;;  %s198_s14 = scalar_lea.hbm %s1237_s1, %s793_s30 }
  0x29   : > { %s200_s20 = sshll.u32 %s198_s14, 4  ;;  %s194_s23 = scalar_lea.vmem [#allocation5], %s792_s5  ;;  %s201_s20 = int_to_ptr.hbm [resolvable:$true] %s200_s20 }
  0x2a   : > { %s202_s25 = sshll.u32 %s194_s23, 4  ;;  %s191_s6 = scalar_lea.sflag [#allocation6], %s1105_s29  ;;  %s203_s25 = int_to_ptr.vmem [resolvable:$true] %s202_s25 }
  0x2b   : > { %s915_s7 = sshra.s32 %s201_s20, 4  ;;  %s922_s13 = scalar_lea.hbm %s1237_s1, 16  ;;  %s916_s7 = int_to_ptr.hbm [resolvable:$true] %s915_s7 }
  0x2c   : > { %s917_s0 = scalar_lea.hbm %s916_s7, 8  ;;  %p923_p4 = scmp.lt.s32.totalorder %s916_s7, %s1237_s1 }
  0x2d   : > { %p918_p9 = scmp.ne.s32.totalorder %s916_s7, %s917_s0  ;;  %p924_p7 = scmp.lt.s32.totalorder %s922_s13, %s917_s0 }
  0x2f   : > { %p920_p0 = pnand %p918_p9, %p889_p3  ;;  %p925_p5 = por %p924_p7, %p923_p4 }
  0x31   : > { %p921_p1 = pneg %p920_p0 }
  0x33   : > { %p926_p8 = pnand %p925_p5, %p921_p1 }
  0x35   : > { %929 = shalt.err (!%p926_p8)
}
  0x36   : > { %823 = dma.hbm_to_vmem [thread:$0]  (!%p1114_p13), %s201_s20, 128, %s203_s25, %s191_s6  }
  0x37   : > { %223 = sbr.rel (%p1138_p2) target bundleno = 608 (0x260), region = 36  ;;  %s1160_s29 = sand.u32 (!%p1138_p2), 1, %s1007_s16  }
  0x38   : > { %s1163_s5 = sshll.u32 (!%p1138_p2), %s1160_s29, 3  ;;  %s226_s22 = scalar_lea.sflag (!%p1138_p2), [#allocation3], %s1160_s29 }
  0x39   : > { %s229_s0 = scalar_lea.vmem (!%p1138_p2), [#allocation2], %s1163_s5 }
  0x3c   : > { %990 = dma.done.wait (%p1089_p6), %s226_s22, 128  }
  0x3d   : > { %992 = vsyncadd (%p1089_p6), %s226_s22, 4294967168  ;;  %s236_s12 = scalar_lea.sflag [#allocation6], %s1160_s29  ;;  %s239_s8 = scalar_lea.vmem [#allocation5], %s1163_s5 }
  0x3e   : > { %994 = dma.done.wait (%p1089_p6), %s236_s12, 128  }
  0x3f   : > { %996 = vsyncadd (%p1089_p6), %s236_s12, 4294967168  ;;  %p276_p13 = scmp.lt.s32.totalorder %s1067_s19, 1  ;;  %v1017_v0 = vmov 16.0   ;;  %v283_v2 = vld [vmem:[%s229_s0] sm:$0xff]  ;;  %v288_v4 = vld [vmem:[%s239_s8] sm:$0xff]  ;;  %vm290_vm0 = vcmask 392192   ;;  %v506_v42 = vlaneseq }
  0x40   : > { %869 = vrcp.f32 %v1017_v0  ;;  %v1018_v38 = vmov 0   ;;  %v1019_v54 = vmov 0.0   ;;  %vm519_vm3 = vcmask 130048   ;;  %s804_s13 = sshll.u32 %s1067_s19, 3  ;;  %s275_s0 = scalar_lea.vmem [#allocation7], %s1163_s5 }
  0x41   : > { %s1179_s14 = scalar_select %p276_p13, %s1067_s19, 1  ;;  %866 = vset.pattern.permute.xlu0 %v1018_v38  ;;  %v507_v45 = vshrl.u32 %v506_v42, 7  ;;  %v510_v46 = vand.u32 127, %v506_v42 }
  0x42   : > { %s673_s22 = scalar_lea.hbm %s1240_s4, %s804_s13  ;;  %s675_s12 = sshll.u32 %s275_s0, 4  ;;  %s676_s12 = int_to_ptr.vmem [resolvable:$true] %s675_s12 }
  0x43   : > { %s278_s25 = scalar_lea.vmem %s1238_s2, %s1179_s14  ;;  %s281_s7 = scalar_lea.vmem %s1239_s3, %s1179_s14  ;;  %vm511_vm2 = vcmp.eq.s32.totalorder %v507_v45, %v510_v46  ;;  %v508_v57 = vadd.s32 8, %v507_v45  ;;  %vm546_vm5 = vcmp.lt.s32.totalorder %v510_v46, 8 }
  0x44   : > { %v867_v3 = vld [vmem:[%s278_s25] ss:$0 sm:$0xff]  ;;  %v800_v55 = vsel %vm511_vm2, 1.0, %v1019_v54  ;;  %s677_s19 = sshll.u32 %s673_s22, 4  ;;  %s663_s8 = scalar_lea.sflag [#allocation4], %s1160_s29  ;;  %s678_s19 = int_to_ptr.hbm [resolvable:$true] %s677_s19 }
  0x45   : > { %v287_v6 = vmul.f32 %v867_v3, %v283_v2  ;;  %v289_v7 = vmul.f32 %v867_v3, %v288_v4  ;;  %vm512_vm4 = vcmp.eq.s32.totalorder %v508_v57, %v510_v46  ;;  %s959_s14 = sshra.s32 %s678_s19, 4  ;;  %s965_s5 = scalar_lea.hbm %s1240_s4, 16  ;;  %s960_s14 = int_to_ptr.hbm [resolvable:$true] %s959_s14 }
  0x46   : > { %v870_v1 = vpop.eup %869  ;;  %v801_v2 = vsel %vm512_vm4, 1.0, %v1019_v54  ;;  %s961_s20 = scalar_lea.hbm %s960_s14, 8  ;;  %p966_p2 = scmp.lt.s32.totalorder %s960_s14, %s1240_s4 }
  0x47   : > { %v301_v5 = vmul.f32 16.0, %v870_v1  ;;  %v291_v8 = vsel %vm290_vm0, %v287_v6, 0.0  ;;  %v292_v9 = vsel %vm290_vm0, %v289_v7, 0.0  ;;  %vm305_vm1 = vweird.f32 %v870_v1  ;;  %p962_p6 = scmp.ne.s32.totalorder %s960_s14, %s961_s20  ;;  %p967_p9 = scmp.lt.s32.totalorder %s965_s5, %s961_s20 }
  0x48   : > { %v293_v11 = vadd.f32 %v292_v9, %v291_v8 }
  0x49   : > { %v302_v10 = vsub.f32 1.0, %v301_v5  ;;  %p963_p3 = pnand %p962_p6, %p1096_p11  ;;  %p968_p0 = por %p967_p9, %p966_p2 }
  0x4a   : > { %v294_v12 = vrot.slane %v293_v11, 4 }
  0x4b   : > { %v303_v13 = vmul.f32 %v870_v1, %v302_v10  ;;  %p964_p10 = pneg %p963_p3 }
  0x4c   : > { %v295_v14 = vadd.f32 %v294_v12, %v293_v11 }
  0x4d   : > { %v304_v16 = vadd.f32 %v870_v1, %v303_v13  ;;  %p969_p1 = pnand %p968_p0, %p964_p10 }
  0x4e   : > { %v296_v15 = vrot.slane %v295_v14, 2 }
  0x4f   : > { %v306_v19 = vsel %vm305_vm1, %v870_v1, %v304_v16 }
  0x50   : > { %v297_v17 = vadd.f32 %v296_v15, %v295_v14 }
  0x52   : > { %v298_v18 = vrot.slane %v297_v17, 1 }
  0x54   : > { %v299_v20 = vadd.f32 %v298_v18, %v297_v17 }
  0x56   : > { %v307_v21 = vmul.f32 %v306_v19, %v299_v20 }
  0x58   : > { %v309_v22 = vsub.f32 %v289_v7, %v307_v21  ;;  %v308_v23 = vsub.f32 %v287_v6, %v307_v21  ;;  %v868_v7 = vld [vmem:[%s281_s7] ss:$0 sm:$0xff] }
  0x5a   : > { %v314_v24 = vsel %vm290_vm0, %v309_v22, 0  ;;  %v311_v25 = vsel %vm290_vm0, %v308_v23, 0  ;;  %v802_v23 = vsel %vm546_vm5, 1.0, %v1019_v54 }
  0x5b   : > { %v330_v26 = vand.u32 4294901760, %v314_v24  ;;  %v332_v27 = vand.u32 4294901760, %v311_v25 }
  0x5d   : > { %807 = vmatpush.xpose.msra.mxu2 %v330_v26  ;;  %v343_v28 = vsub.f32 %v314_v24, %v330_v26  ;;  %v335_v29 = vsub.f32 %v311_v25, %v332_v27  ;;  %331 = vmatpush.xpose.msra.mxu0 %v330_v26  ;;  %v561_v24 = vsub.f32 1.0, %v802_v23 }
  0x5f   : > { %v344_v30 = vand.u32 4294901760, %v343_v28  ;;  %v336_v31 = vand.u32 4294901760, %v335_v29 }
  0x61   : > { %808 = vmatpush.xpose.msra.mxu2 %v332_v27  ;;  %v345_v32 = vsub.f32 %v343_v28, %v344_v30  ;;  %v337_v33 = vsub.f32 %v335_v29, %v336_v31  ;;  %333 = vmatpush.xpose.msra.mxu0 %v332_v27 }
  0x63   : > { %v346_v34 = vand.u32 4294901760, %v345_v32  ;;  %v338_v35 = vand.u32 4294901760, %v337_v33 }
  0x65   : > { %402 = vmatpush.xpose.msrb.mxu2 %v343_v28  ;;  %465 = vmatpush.xpose.msrb.mxu0 %v344_v30 }
  0x66   : > { %347 = vmatmul.f32.vlgmr.msra.gmra.mxu2 %v346_v34  ;;  %809 = vmatpush.xpose.msra.mxu3 %v346_v34 }
  0x67   : > { %370 = vmatpush.xpose.msra.mxu1 %v346_v34  ;;  %339 = vmatmul.f32.vlgmr.msra.gmra.mxu0 %v338_v35 }
  0x69   : > { %405 = vmatpush.xpose.msrb.mxu2 %v335_v29  ;;  %469 = vmatpush.xpose.msrb.mxu0 %v336_v31 }
  0x6a   : > { %810 = vmatpush.xpose.msra.mxu3 %v338_v35 }
  0x6b   : > { %376 = vmatpush.xpose.msra.mxu1 %v338_v35 }
  0x6d   : > { %382 = vmatmul.f32.vlgmr.msra.gmra.mxu3 %v330_v26 }
  0x6e   : > { %432 = vmatpush.xpose.msrb.mxu3 %v330_v26  ;;  %408 = vmatmul.f32.vlgmr.msrb.gmra.mxu2 %v335_v29 }
  0x6f   : > { %494 = vmatpush.xpose.msrb.mxu1 %v330_v26  ;;  %471 = vmatmul.f32.vlgmr.msrb.gmra.mxu0 %v332_v27 }
  0x70   : > { %378 = vmatmul.f32.vlgmr.msra.gmra.mxu1 %v332_v27 }
  0x72   : > { %434 = vmatpush.xpose.msrb.mxu3 %v332_v27 }
  0x73   : > { %496 = vmatpush.xpose.msrb.mxu1 %v332_v27 }
  0x75   : > { %438 = vmatmul.f32.vlgmr.msrb.gmra.mxu3 %v336_v31 }
  0x76   : > { %413 = vmatmul.f32.gmra.mxu2 %v343_v28 }
  0x77   : > { %475 = vmatmul.f32.gmra.mxu0 %v330_v26 }
  0x78   : > { %498 = vmatmul.f32.vlgmr.msrb.gmra.mxu1 %v332_v27 }
  0x7d   : > { %444 = vmatmul.f32.gmra.mxu3 %v344_v30  ;;  %v1020_v30 = vmov 8.0  }
  0x80   : > { %502 = vmatmul.f32.gmra.mxu1 %v330_v26 }
  0xe4   : > { %v340_v37 = vpop.f32.mrf.mxu0 }
  0xe9   : > { %v348_v36 = vpop.f32.mrf.mxu2 }
  0xec   : > { %v472_v47 = vpop.f32.mrf.mxu0 }
  0xed   : > { %v379_v40 = vpop.f32.mrf.mxu1 }
  0xee   : > { %v380_v44 = vadd.f32 %v379_v40, %v340_v37 }
  0xf0   : > { %v383_v39 = vpop.f32.mrf.mxu3 }
  0xf1   : > { %v384_v41 = vadd.f32 %v383_v39, %v348_v36  ;;  %v409_v43 = vpop.f32.mrf.mxu2 }
  0xf2   : > { %v410_v48 = vadd.f32 %v409_v43, %v380_v44 }
  0xf4   : > { %v476_v61 = vpop.f32.mrf.mxu0 }
  0xf5   : > { %v499_v50 = vpop.f32.mrf.mxu1 }
  0xf8   : > { %v439_v49 = vpop.f32.mrf.mxu3 }
  0xf9   : > { %v440_v51 = vadd.f32 %v439_v49, %v410_v48  ;;  %v414_v53 = vpop.f32.mrf.mxu2 }
  0xfa   : > { %v415_v58 = vadd.f32 %v414_v53, %v384_v41 }
  0xfb   : > { %v473_v52 = vadd.f32 %v472_v47, %v440_v51 }
  0xfd   : > { %v500_v56 = vadd.f32 %v499_v50, %v473_v52  ;;  %v503_v0 = vpop.f32.mrf.mxu1 }
  0xff   : > { %v517_v59 = vmul.f32 %v800_v55, %v500_v56  ;;  %v532_v15 = vmul.f32 2.0, %v500_v56 }
 0x100   : > { %v445_v60 = vpop.f32.mrf.mxu3 }
 0x101   : > { %v446_v62 = vadd.f32 %v445_v60, %v415_v58  ;;  %v520_v63 = vsel %vm519_vm3, %v517_v59, 0.0 }
 0x102   : > { %521 = vadd.xlane.f32.xlu0 %v520_v63 }
 0x103   : > { %v477_v1 = vadd.f32 %v476_v61, %v446_v62 }
 0x105   : > { %v504_v3 = vadd.f32 %v503_v0, %v477_v1 }
 0x107   : > { %v518_v4 = vmul.f32 %v801_v2, %v504_v3 }
 0x109   : > { %v523_v5 = vsel %vm519_vm3, %v518_v4, 0.0 }
 0x10a   : > { %v524_v6 = vadd.f32 %v523_v5, %v520_v63 }
 0x10c   : > { %v525_v8 = vrot.slane %v524_v6, 4 }
 0x10e   : > { %v526_v9 = vadd.f32 %v525_v8, %v524_v6 }
 0x110   : > { %v527_v10 = vrot.slane %v526_v9, 2 }
 0x112   : > { %v528_v11 = vadd.f32 %v527_v10, %v526_v9 }
 0x114   : > { %v529_v12 = vrot.slane %v528_v11, 1 }
 0x116   : > { %540 = vperm.xlu0 %866, %v868_v7   ;;  %v530_v13 = vadd.f32 %v529_v12, %v528_v11 }
 0x175   : > { %v522_v14 = vpop.xlane.xlu0 %521 }
 0x176   : > { %v531_v16 = vadd.f32 %v530_v13, %v522_v14 }
 0x178   : > { %v533_v17 = vsub.f32 %v531_v16, %v532_v15 }
 0x17a   : > { %v534_v18 = vmax.f32 %v533_v17, 0.0 }
 0x17c   : > { %v535_v19 = vsub.f32 0.0, %v534_v18 }
 0x188   : > { %v541_v20 = vpop.permute.xlu0 %540 }
 0x189   : > { %v543_v21 = vmul.f32 %v541_v20, %v535_v19 }
 0x18b   : > { %v544_v22 = vmul.f32 1.442695, %v543_v21 }
 0x18d   : > { %871 = vpow2.f32 %v544_v22 }
 0x18e   : > { %873 = vrcp.f32 %v1020_v30 }
 0x193   : > { %v872_v25 = vpop.eup %871 }
 0x194   : > { %v562_v26 = vmul.f32 %v872_v25, %v561_v24  ;;  %v549_v28 = vmul.f32 %v872_v25, %v802_v23  ;;  %v874_v31 = vpop.eup %873 }
 0x195   : > { %v554_v32 = vmul.f32 8.0, %v874_v31  ;;  %vm558_vm6 = vweird.f32 %v874_v31 }
 0x196   : > { %v563_v27 = vsel %vm519_vm3, %v562_v26, 0.0  ;;  %v550_v29 = vsel %vm519_vm3, %v549_v28, 0.0 }
 0x197   : > { %564 = vadd.xlane.f32.xlu1 %v563_v27  ;;  %v555_v33 = vsub.f32 1.0, %v554_v32 }
 0x199   : > { %v556_v34 = vmul.f32 %v874_v31, %v555_v33 }
 0x19b   : > { %v557_v35 = vadd.f32 %v874_v31, %v556_v34 }
 0x19d   : > { %v559_v36 = vsel %vm558_vm6, %v874_v31, %v557_v35 }
 0x19f   : > { %551 = vadd.xlane.f32.xlu1 %v550_v29 }
 0x20a   : > { %v565_v37 = vpop.xlane.xlu1 %564 }
 0x20b   : > { %v566_v38 = vmul.f32 %v565_v37, %v559_v36 }
 0x20d   : > { %v589_v39 = vrot.slane %v566_v38, 4 }
 0x20f   : > { %v590_v40 = vadd.f32 %v589_v39, %v566_v38 }
 0x211   : > { %v591_v41 = vrot.slane %v590_v40, 2 }
 0x212   : > { %v552_v42 = vpop.xlane.xlu1 %551 }
 0x213   : > { %v592_v43 = vadd.f32 %v591_v41, %v590_v40  ;;  %v560_v44 = vmul.f32 %v559_v36, %v552_v42 }
 0x215   : > { %v593_v45 = vrot.slane %v592_v43, 1  ;;  %v567_v46 = vrot.slane %v560_v44, 4 }
 0x217   : > { %v594_v47 = vadd.f32 %v593_v45, %v592_v43  ;;  %v568_v48 = vadd.f32 %v567_v46, %v560_v44 }
 0x219   : > { %v595_v49 = vadd.f32 1e-32, %v594_v47  ;;  %v569_v50 = vrot.slane %v568_v48, 2 }
 0x21b   : > { %875 = vrcp.f32 %v595_v49  ;;  %v570_v51 = vadd.f32 %v569_v50, %v568_v48  ;;  %v607_v58 = vand.u32 2147483648, %v595_v49  ;;  %v605_v60 = vand.u32 2147483647, %v595_v49 }
 0x21c   : > { %vm601_vm8 = vweird.f32 %v595_v49 }
 0x21d   : > { %v571_v52 = vrot.slane %v570_v51, 1  ;;  %v608_v62 = vor.u32 1.1754944e-38, %v607_v58  ;;  %vm606_vm10 = vcmp.eq.f32.partialorder %v605_v60, 8.507059e+37 }
 0x21f   : > { %v572_v53 = vadd.f32 %v571_v52, %v570_v51 }
 0x221   : > { %v876_v54 = vpop.eup %875  ;;  %v573_v56 = vadd.f32 1e-32, %v572_v53 }
 0x222   : > { %v597_v55 = vmul.f32 %v876_v54, %v595_v49  ;;  %vm602_vm7 = vweird.f32 %v876_v54 }
 0x223   : > { %877 = vrcp.f32 %v573_v56  ;;  %vm603_vm9 = vmor %vm601_vm8, %vm602_vm7  ;;  %v585_v6 = vand.u32 2147483648, %v573_v56  ;;  %v583_v8 = vand.u32 2147483647, %v573_v56  ;;  %vm579_vm12 = vweird.f32 %v573_v56 }
 0x224   : > { %v598_v57 = vsub.f32 1.0, %v597_v55 }
 0x225   : > { %v586_v10 = vor.u32 1.1754944e-38, %v585_v6  ;;  %vm584_vm14 = vcmp.eq.f32.partialorder %v583_v8, 8.507059e+37 }
 0x226   : > { %v599_v59 = vmul.f32 %v876_v54, %v598_v57 }
 0x228   : > { %v600_v61 = vadd.f32 %v876_v54, %v599_v59 }
 0x229   : > { %v878_v63 = vpop.eup %877 }
 0x22a   : > { %v604_v0 = vsel %vm603_vm9, %v876_v54, %v600_v61  ;;  %v575_v2 = vmul.f32 %v878_v63, %v573_v56  ;;  %vm580_vm11 = vweird.f32 %v878_v63 }
 0x22b   : > { %v609_v1 = vsel %vm606_vm10, %v608_v62, %v604_v0  ;;  %vm581_vm13 = vmor %vm579_vm12, %vm580_vm11 }
 0x22c   : > { %v610_v3 = vmul.f32 %v609_v1, %v566_v38  ;;  %v576_v4 = vsub.f32 1.0, %v575_v2 }
 0x22e   : > { %v612_v5 = vadd.f32 1e-32, %v610_v3  ;;  %v577_v7 = vmul.f32 %v878_v63, %v576_v4 }
 0x230   : > { %879 = vrcp.f32 %v612_v5  ;;  %v578_v9 = vadd.f32 %v878_v63, %v577_v7  ;;  %v624_v19 = vand.u32 2147483648, %v612_v5  ;;  %v622_v21 = vand.u32 2147483647, %v612_v5 }
 0x231   : > { %vm618_vm0 = vweird.f32 %v612_v5 }
 0x232   : > { %v582_v11 = vsel %vm581_vm13, %v878_v63, %v578_v9  ;;  %v625_v25 = vor.u32 1.1754944e-38, %v624_v19  ;;  %vm623_vm2 = vcmp.eq.f32.partialorder %v622_v21, 8.507059e+37 }
 0x233   : > { %v587_v12 = vsel %vm584_vm14, %v586_v10, %v582_v11 }
 0x234   : > { %v588_v13 = vmul.f32 %v587_v12, %v560_v44 }
 0x236   : > { %v880_v14 = vpop.eup %879  ;;  %v638_v16 = vrot.slane %v588_v13, 4  ;;  %vm611_vm3 = vcmp.gt.f32.partialorder %v588_v13, 0.0 }
 0x237   : > { %v614_v15 = vmul.f32 %v880_v14, %v612_v5  ;;  %vm619_vm15 = vweird.f32 %v880_v14 }
 0x238   : > { %v639_v18 = vadd.f32 %v638_v16, %v588_v13  ;;  %vm620_vm1 = vmor %vm618_vm0, %vm619_vm15 }
 0x239   : > { %v615_v17 = vsub.f32 1.0, %v614_v15 }
 0x23a   : > { %v640_v22 = vrot.slane %v639_v18, 2 }
 0x23b   : > { %v616_v20 = vmul.f32 %v880_v14, %v615_v17 }
 0x23c   : > { %v641_v24 = vadd.f32 %v640_v22, %v639_v18 }
 0x23d   : > { %v617_v23 = vadd.f32 %v880_v14, %v616_v20 }
 0x23e   : > { %v642_v27 = vrot.slane %v641_v24, 1 }
 0x23f   : > { %v621_v26 = vsel %vm620_vm1, %v880_v14, %v617_v23 }
 0x240   : > { %v626_v28 = vsel %vm623_vm2, %v625_v25, %v621_v26  ;;  %v643_v30 = vadd.f32 %v642_v27, %v641_v24 }
 0x241   : > { %v627_v29 = vmul.f32 %v626_v28, %v588_v13 }
 0x242   : > { %v644_v31 = vadd.f32 1e-32, %v643_v30 }
 0x243   : > { %881 = vlog2.f32 %v627_v29 }
 0x244   : > { %883 = vrcp.f32 %v644_v31  ;;  %v656_v44 = vand.u32 2147483648, %v644_v31  ;;  %vm650_vm5 = vweird.f32 %v644_v31  ;;  %v654_v46 = vand.u32 2147483647, %v644_v31 }
 0x246   : > { %v657_v49 = vor.u32 1.1754944e-38, %v656_v44  ;;  %vm655_vm7 = vcmp.eq.f32.partialorder %v654_v46, 8.507059e+37 }
 0x249   : > { %v882_v32 = vpop.eup %881 }
 0x24a   : > { %v629_v33 = vmul.f32 0.6931472, %v882_v32  ;;  %v884_v34 = vpop.eup %883 }
 0x24b   : > { %v646_v36 = vmul.f32 %v884_v34, %v644_v31  ;;  %vm651_vm4 = vweird.f32 %v884_v34 }
 0x24c   : > { %v630_v35 = vmul.f32 %v629_v33, %v588_v13  ;;  %vm652_vm6 = vmor %vm650_vm5, %vm651_vm4 }
 0x24d   : > { %v647_v38 = vsub.f32 1.0, %v646_v36 }
 0x24e   : > { %v631_v37 = vsel %vm611_vm3, %v630_v35, 0.0 }
 0x24f   : > { %v632_v39 = vrot.slane %v631_v37, 4  ;;  %v648_v40 = vmul.f32 %v884_v34, %v647_v38 }
 0x251   : > { %v633_v41 = vadd.f32 %v632_v39, %v631_v37  ;;  %v649_v43 = vadd.f32 %v884_v34, %v648_v40 }
 0x253   : > { %v634_v42 = vrot.slane %v633_v41, 2  ;;  %v653_v48 = vsel %vm652_vm6, %v884_v34, %v649_v43 }
 0x254   : > { %v658_v51 = vsel %vm655_vm7, %v657_v49, %v653_v48 }
 0x255   : > { %v635_v45 = vadd.f32 %v634_v42, %v633_v41 }
 0x257   : > { %v636_v47 = vrot.slane %v635_v45, 1 }
 0x259   : > { %v637_v50 = vadd.f32 %v636_v47, %v635_v45 }
 0x25b   : > { %v659_v52 = vmul.f32 %v658_v51, %v637_v50 }
 0x25d   : > { %661 = vst [vmem:[%s275_s0] sm:$0xff] %v659_v52 }
 0x25e   : > { %972 = shalt.err (!%p969_p1)
}
 0x25f   : > { %815 = dma.vmem_to_hbm [thread:$0]  (%p1096_p11), %s676_s12, 128, %s678_s19, %s663_s8  }
 0x260 PF: > { %s689_s29 = sand.u32 1, %s1003_s15   ;;  %p1249_p4 = scmp.ge.s32.totalorder %s1015_s18, 2 }
 0x261   : > { %s690_s7 = scalar_lea.sflag [#allocation4], %s689_s29 }
 0x262   : > { %p825_p7 = pnand %p1249_p4, %p1100_p12 }
 0x264   : > { %p826_p5 = pneg %p825_p7 }
 0x266   : > { %998 = dma.done.wait (%p826_p5), %s690_s7, 128  }
 0x267   : > { %1000 = vsyncadd (%p826_p5), %s690_s7, 4294967168  ;;  %p20_p8 = scmp.ge.s32.totalorder %s1071_s21, 4   ;;  %s1250_s15 = smov %s1007_s16 }
 0x268   : > { %s1251_s16 = smov %s1011_s17  ;;  %s1252_s17 = smov %s1083_s24 }
 0x269   : > { %s1253_s18 = smov %s1071_s21  ;;  %22 = sbr.rel (!%p20_p8) target bundleno = 9 (0x9), region = 100 }
 0x26e   :  { %696 = vsyncpa [#allocation3], 1 }
 0x26f   :  { %698 = vsyncpa [#allocation3 + $0x1], 1 }
 0x270   :  { %699 = vsyncpa [#allocation6], 1 }
 0x271   :  { %701 = vsyncpa [#allocation6 + $0x1], 1 }
 0x272   :  { %702 = vsyncpa [#allocation4], 1 }
 0x273   :  { %704 = vsyncpa [#allocation4 + $0x1], 1 }

</bundles_post_ra>
